<compile_context>
chip_gen: v5e
topology: v5e:2x2
jax: 0.10.0
libtpu: 0.0.40
codegen_flags: <defaults>
</compile_context>

<pallas_src>
import jax
import jax.numpy as jnp
import numpy as np
from jax.experimental import pallas as pl
from jax.experimental.pallas import tpu as pltpu

# ---- module hyperparameters (LinearAttention(dim, heads=4, dim_head=32)) ----
DIM = 32            # channels of x
HEADS = 4
DIM_HEAD = 32
HIDDEN = HEADS * DIM_HEAD          # 128
SCALE = DIM_HEAD ** (-0.5)
INV_SCALE = DIM_HEAD ** 0.5
EPS = 1e-5                         # GroupNorm default eps

BATCH = 2
SEQ = 128                          # time length (lane-friendly)


def _linear_attention_kernel(x_ref, wqkv_ref, wout_ref, ones_bd_ref,
                             params_ref, o_ref):
    # Resident operands (block index constant across the grid -> DMA'd once).
    wqkv = wqkv_ref[...]                        # (3H, C)  bf16
    wout = wout_ref[...]                        # (C, H)   bf16
    ones_bd = ones_bd_ref[...]                  # (H, H)   bf16, INV_SCALE on same-head blocks
    same_head = ones_bd != jnp.bfloat16(0.0)    # derived mask (one compare)
    params = params_ref[...]                    # (C, 3)   f32: [b_out | gamma | beta]
    bout = params[:, 0:1]
    gamma = params[:, 1:2]
    beta = params[:, 2:3]

    bb_block, C, T = x_ref.shape
    inv_n = 1.0 / float(C * T)

    # Static Python loop over the batch elements in this block.  The per-batch
    # chains are fully independent, so on a single TensorCore the scheduler can
    # overlap batch-0 EUP work (exp / reciprocal) with batch-1 MXU matmuls.
    for bb in range(bb_block):
        x = x_ref[bb]                                              # (C, T) bf16

        # to_qkv: Conv1d(dim, 3*hidden, 1, bias=False) == (3H, C) @ (C, T).
        qkv = jnp.dot(wqkv, x, preferred_element_type=jnp.float32)  # (3H, T) f32
        q = qkv[0:HIDDEN]
        k = qkv[HIDDEN:2 * HIDDEN]
        v = qkv[2 * HIDDEN:3 * HIDDEN]

        # q: softmax over dim_head (per head, per time step).  A single column
        # max over all 128 rows is a valid shared stabilizer: softmax is
        # invariant to per-column shifts within each head's 32-row block.
        q_exp = jnp.exp(q - jnp.max(q, axis=0, keepdims=True))      # f32, EUP
        # Per-head column sums via one MXU matmul against the block-diagonal
        # constant (1/scale folded in) -> q_n = softmax(q) * scale.
        q_den = jnp.dot(ones_bd, q_exp.astype(jnp.bfloat16),
                        preferred_element_type=jnp.float32)         # (H, T)
        q_n = q_exp * pl.reciprocal(q_den, approx=True)

        # k: softmax over time (per row).
        k_exp = jnp.exp(k - jnp.max(k, axis=1, keepdims=True))
        k_n = k_exp * pl.reciprocal(jnp.sum(k_exp, axis=1, keepdims=True),
                                    approx=True)

        # Linear attention, all heads fused into full-width MXU matmuls:
        #   ctxT[a, b] = sum_t v[a, t] * k_n[b, t]   ( = context^T )
        ctxT = jax.lax.dot_general(
            v.astype(jnp.bfloat16), k_n.astype(jnp.bfloat16),
            dimension_numbers=(((1,), (1,)), ((), ())),
            preferred_element_type=jnp.float32)                     # (H, H)
        ctxT = jnp.where(same_head, ctxT, 0.0)                      # keep per-head blocks
        out = jnp.dot(ctxT.astype(jnp.bfloat16), q_n.astype(jnp.bfloat16),
                      preferred_element_type=jnp.float32)           # (H, T)

        # to_out[0]: Conv1d(hidden, dim, 1, bias=True) == (C, H) @ (H, T) + b.
        y = jnp.dot(wout, out.astype(jnp.bfloat16),
                    preferred_element_type=jnp.float32) + bout      # (C, T) f32

        # to_out[1]: GroupNorm(1, dim) over all (C, T).  One combined lane-axis
        # reduction for sum and sum-of-squares (sublane-concatenated), then the
        # affine is folded into a single fused multiply-add.
        both = jnp.concatenate([y, y * y], axis=0)                  # (2C, T)
        col = jnp.sum(both, axis=1, keepdims=True)                  # (2C, 1)
        mu = jnp.sum(col[:C]) * inv_n
        ms = jnp.sum(col[C:]) * inv_n
        rstd = jax.lax.rsqrt(ms - mu * mu + EPS)
        scale = gamma * rstd                                        # (C, 1)
        shift = beta - mu * scale
        o_ref[bb] = y * scale + shift


def _batch_block_size(batch):
    """Batch elements folded into one kernel body.

    Single-TensorCore chips (v5e / v6e): fold the whole batch so the
    independent per-batch chains interleave on one core and the per-grid-step
    overhead is paid once.  Multi-TensorCore chips (v7x, and v4/v5p megacore):
    keep one batch element per grid step so dimension_semantics=("parallel",)
    shards the batch across cores.  Either choice is correct on any chip.
    """
    try:
        kind = jax.devices()[0].device_kind.lower().replace(" ", "").replace("-", "")
    except Exception:
        return 1
    single_tc = any(tag in kind for tag in ("lite", "v5e", "v6e", "v6"))
    bb = batch if single_tc else 1
    if batch % bb != 0:
        bb = 1
    return bb


def linear_attention(x, wqkv, wout, bout, gamma, beta):
    B, C, T = x.shape
    H3 = wqkv.shape[0]
    BB = _batch_block_size(B)

    # Pre-cast matmul operands to bf16 (f32 accumulation happens in-kernel via
    # preferred_element_type); halves the input DMA bytes and removes the
    # per-step operand casts.
    x_bf = x.astype(jnp.bfloat16)
    wqkv_bf = wqkv.astype(jnp.bfloat16)
    wout_bf = wout.astype(jnp.bfloat16)

    # Hoisted block-diagonal constant: INV_SCALE on each head's 32x32 diagonal
    # block, 0 elsewhere.  32 KB bf16, resident across the whole grid.
    ones_bd = jnp.asarray(
        np.kron(np.eye(HEADS, dtype=np.float32),
                np.ones((DIM_HEAD, DIM_HEAD), dtype=np.float32)) * INV_SCALE,
        dtype=jnp.bfloat16)

    # Pack the three tiny per-channel parameters into one (C, 3) input.
    params = jnp.concatenate([bout, gamma, beta], axis=1).astype(jnp.float32)

    return pl.pallas_call(
        _linear_attention_kernel,
        out_shape=jax.ShapeDtypeStruct((B, C, T), jnp.float32),
        grid_spec=pltpu.PrefetchScalarGridSpec(
            num_scalar_prefetch=0,
            grid=(B // BB,),
            in_specs=[
                pl.BlockSpec((BB, C, T), lambda i: (i, 0, 0)),       # x (bf16)
                pl.BlockSpec((H3, C), lambda i: (0, 0)),             # W_qkv (bf16)
                pl.BlockSpec((C, HIDDEN), lambda i: (0, 0)),         # W_out (bf16)
                pl.BlockSpec((HIDDEN, HIDDEN), lambda i: (0, 0)),    # block-diag const
                pl.BlockSpec((C, 3), lambda i: (0, 0)),              # [b_out|gamma|beta]
            ],
            out_specs=pl.BlockSpec((BB, C, T), lambda i: (i, 0, 0)),
        ),
        compiler_params=pltpu.CompilerParams(
            dimension_semantics=("parallel",)),
    )(x_bf, wqkv_bf, wout_bf, ones_bd, params)


# ---------------- pure-JAX f32 reference (for correctness check) ----------------
def linear_attention_ref(x, wqkv, wout, bout, gamma, beta):
    B, C, T = x.shape
    qkv = jnp.einsum('oc,bct->bot', wqkv, x)                 # (B, 3H, T)
    q, k, v = jnp.split(qkv, 3, axis=1)
    q = q.reshape(B, HEADS, DIM_HEAD, T)
    k = k.reshape(B, HEADS, DIM_HEAD, T)
    v = v.reshape(B, HEADS, DIM_HEAD, T)
    q = jax.nn.softmax(q, axis=-2) * SCALE
    k = jax.nn.softmax(k, axis=-1)
    context = jnp.einsum('bhit,bhjt->bhij', k, v)
    out = jnp.einsum('bhij,bhit->bhjt', context, q)
    out = out.reshape(B, HIDDEN, T)
    y = jnp.einsum('ch,bht->bct', wout, out) + bout[None, :, :]
    mu = jnp.mean(y, axis=(1, 2), keepdims=True)
    var = jnp.mean((y - mu) ** 2, axis=(1, 2), keepdims=True)
    y = (y - mu) / jnp.sqrt(var + EPS)
    return y * gamma[None, :, :] + beta[None, :, :]


if __name__ == "__main__":
    key = jax.random.PRNGKey(0)
    k_x, k_qkv, k_wo, k_bo = jax.random.split(key, 4)

    x = jax.random.normal(k_x, (BATCH, DIM, SEQ), dtype=jnp.float32)

    # Deterministic synthetic parameters (shapes match nn.Conv1d / GroupNorm).
    wqkv = jax.random.normal(k_qkv, (3 * HIDDEN, DIM), dtype=jnp.float32) * (DIM ** -0.5)
    wout = jax.random.normal(k_wo, (DIM, HIDDEN), dtype=jnp.float32) * (HIDDEN ** -0.5)
    bout = jax.random.normal(k_bo, (DIM, 1), dtype=jnp.float32) * 0.1
    gamma = jnp.ones((DIM, 1), dtype=jnp.float32)   # GroupNorm weight
    beta = jnp.zeros((DIM, 1), dtype=jnp.float32)   # GroupNorm bias

    out = linear_attention(x, wqkv, wout, bout, gamma, beta)
    out = jax.block_until_ready(out)

    ref = linear_attention_ref(x, wqkv, wout, bout, gamma, beta)
    # bf16 matmul operands + approx reciprocal => widen tolerance vs pure-f32 ref.
    np.testing.assert_allclose(np.asarray(out), np.asarray(ref),
                               rtol=5e-2, atol=5e-2)
    print("KERNEL_OK")
</pallas_src>

<mosaic_0001>
module attributes {stable_mosaic.version = 11 : i64} {
  func.func @_linear_attention_kernel(%arg0: i32, %arg1: memref<1x32x128xbf16, #tpu.memory_space<vmem>>, %arg2: memref<384x32xbf16, #tpu.memory_space<vmem>>, %arg3: memref<32x128xbf16, #tpu.memory_space<vmem>>, %arg4: memref<128x128xbf16, #tpu.memory_space<vmem>>, %arg5: memref<32x3xf32, #tpu.memory_space<vmem>>, %arg6: memref<1x32x128xf32, #tpu.memory_space<vmem>>) attributes {dimension_semantics = [#tpu.dimension_semantics<parallel>], iteration_bounds = array<i64: 2>, scalar_prefetch = 0 : i64, scratch_operands = 0 : i64, tpu.core_type = #tpu.core_type<tc>, window_params = [{transform_indices = @transform_0, window_bounds = array<i64: 1, 32, 128>}, {pipeline_mode = #tpu.pipeline_mode<synchronous>, transform_indices = @transform_1, window_bounds = array<i64: 384, 32>}, {pipeline_mode = #tpu.pipeline_mode<synchronous>, transform_indices = @transform_2, window_bounds = array<i64: 32, 128>}, {pipeline_mode = #tpu.pipeline_mode<synchronous>, transform_indices = @transform_3, window_bounds = array<i64: 128, 128>}, {pipeline_mode = #tpu.pipeline_mode<synchronous>, transform_indices = @transform_4, window_bounds = array<i64: 32, 3>}, {transform_indices = @transform_5, window_bounds = array<i64: 1, 32, 128>}]} {
    %c0 = arith.constant 0 : index
    %c0_0 = arith.constant 0 : index
    %0 = vector.load %arg2[%c0, %c0_0] : memref<384x32xbf16, #tpu.memory_space<vmem>>, vector<384x32xbf16>
    %c0_1 = arith.constant 0 : index
    %c0_2 = arith.constant 0 : index
    %1 = vector.load %arg3[%c0_1, %c0_2] : memref<32x128xbf16, #tpu.memory_space<vmem>>, vector<32x128xbf16>
    %c0_3 = arith.constant 0 : index
    %c0_4 = arith.constant 0 : index
    %2 = vector.load %arg4[%c0_3, %c0_4] : memref<128x128xbf16, #tpu.memory_space<vmem>>, vector<128x128xbf16>
    %cst = arith.constant 0.000000e+00 : bf16
    %3 = vector.broadcast %cst : bf16 to vector<128x128xbf16>
    %4 = arith.cmpf one, %2, %3 : vector<128x128xbf16>
    %c0_5 = arith.constant 0 : index
    %c0_6 = arith.constant 0 : index
    %5 = vector.load %arg5[%c0_5, %c0_6] : memref<32x3xf32, #tpu.memory_space<vmem>>, vector<32x3xf32>
    %6 = vector.extract_strided_slice %5 {offsets = [0, 0], sizes = [32, 1], strides = [1, 1]} : vector<32x3xf32> to vector<32x1xf32>
    %7 = vector.extract_strided_slice %5 {offsets = [0, 1], sizes = [32, 1], strides = [1, 1]} : vector<32x3xf32> to vector<32x1xf32>
    %8 = vector.extract_strided_slice %5 {offsets = [0, 2], sizes = [32, 1], strides = [1, 1]} : vector<32x3xf32> to vector<32x1xf32>
    %c0_7 = arith.constant 0 : index
    %c0_8 = arith.constant 0 : index
    %c0_9 = arith.constant 0 : index
    %9 = vector.load %arg1[%c0_7, %c0_8, %c0_9] : memref<1x32x128xbf16, #tpu.memory_space<vmem>>, vector<1x32x128xbf16>
    %10 = vector.shape_cast %9 : vector<1x32x128xbf16> to vector<32x128xbf16>
    %cst_10 = arith.constant dense<0.000000e+00> : vector<384x128xf32>
    %11 = tpu.matmul %0, %10, %cst_10 {dimension_numbers = #tpu.dot_dimension_numbers<[1], [0], [0], [1], [0, 0, 1, 1], [], []>} : vector<384x32xbf16>, vector<32x128xbf16>, vector<384x128xf32> -> vector<384x128xf32>
    %12 = vector.extract_strided_slice %11 {offsets = [0, 0], sizes = [128, 128], strides = [1, 1]} : vector<384x128xf32> to vector<128x128xf32>
    %13 = vector.extract_strided_slice %11 {offsets = [128, 0], sizes = [128, 128], strides = [1, 1]} : vector<384x128xf32> to vector<128x128xf32>
    %14 = vector.extract_strided_slice %11 {offsets = [256, 0], sizes = [128, 128], strides = [1, 1]} : vector<384x128xf32> to vector<128x128xf32>
    %cst_11 = arith.constant dense<0xFF800000> : vector<128xf32>
    %15 = vector.multi_reduction <maximumf>, %12, %cst_11 [0] : vector<128x128xf32> to vector<128xf32>
    %16 = vector.shape_cast %15 : vector<128xf32> to vector<1x128xf32>
    %17 = vector.broadcast %16 : vector<1x128xf32> to vector<128x128xf32>
    %18 = arith.subf %12, %17 : vector<128x128xf32>
    %19 = math.exp %18 : vector<128x128xf32>
    %20 = arith.truncf %19 : vector<128x128xf32> to vector<128x128xbf16>
    %cst_12 = arith.constant dense<0.000000e+00> : vector<128x128xf32>
    %21 = tpu.matmul %2, %20, %cst_12 {dimension_numbers = #tpu.dot_dimension_numbers<[1], [0], [0], [1], [0, 0, 1, 1], [], []>} : vector<128x128xbf16>, vector<128x128xbf16>, vector<128x128xf32> -> vector<128x128xf32>
    %22 = tpu.reciprocal %21 {approx = true} : vector<128x128xf32> -> vector<128x128xf32>
    %23 = arith.mulf %19, %22 : vector<128x128xf32>
    %cst_13 = arith.constant dense<0xFF800000> : vector<128xf32>
    %24 = vector.multi_reduction <maximumf>, %13, %cst_13 [1] : vector<128x128xf32> to vector<128xf32>
    %25 = vector.shape_cast %24 : vector<128xf32> to vector<128x1xf32>
    %26 = vector.broadcast %25 : vector<128x1xf32> to vector<128x128xf32>
    %27 = arith.subf %13, %26 : vector<128x128xf32>
    %28 = math.exp %27 : vector<128x128xf32>
    %cst_14 = arith.constant dense<0.000000e+00> : vector<128xf32>
    %29 = vector.multi_reduction <add>, %28, %cst_14 [1] : vector<128x128xf32> to vector<128xf32>
    %30 = vector.shape_cast %29 : vector<128xf32> to vector<128x1xf32>
    %31 = tpu.reciprocal %30 {approx = true} : vector<128x1xf32> -> vector<128x1xf32>
    %32 = vector.broadcast %31 : vector<128x1xf32> to vector<128x128xf32>
    %33 = arith.mulf %28, %32 : vector<128x128xf32>
    %34 = arith.truncf %14 : vector<128x128xf32> to vector<128x128xbf16>
    %35 = arith.truncf %33 : vector<128x128xf32> to vector<128x128xbf16>
    %cst_15 = arith.constant dense<0.000000e+00> : vector<128x128xf32>
    %36 = tpu.matmul %34, %35, %cst_15 {dimension_numbers = #tpu.dot_dimension_numbers<[1], [1], [0], [0], [0, 0, 1, 0], [], []>} : vector<128x128xbf16>, vector<128x128xbf16>, vector<128x128xf32> -> vector<128x128xf32>
    %cst_16 = arith.constant 0.000000e+00 : f32
    %37 = vector.broadcast %cst_16 : f32 to vector<128x128xf32>
    %38 = arith.select %4, %36, %37 : vector<128x128xi1>, vector<128x128xf32>
    %39 = arith.truncf %38 : vector<128x128xf32> to vector<128x128xbf16>
    %40 = arith.truncf %23 : vector<128x128xf32> to vector<128x128xbf16>
    %cst_17 = arith.constant dense<0.000000e+00> : vector<128x128xf32>
    %41 = tpu.matmul %39, %40, %cst_17 {dimension_numbers = #tpu.dot_dimension_numbers<[1], [0], [0], [1], [0, 0, 1, 1], [], []>} : vector<128x128xbf16>, vector<128x128xbf16>, vector<128x128xf32> -> vector<128x128xf32>
    %42 = arith.truncf %41 : vector<128x128xf32> to vector<128x128xbf16>
    %cst_18 = arith.constant dense<0.000000e+00> : vector<32x128xf32>
    %43 = tpu.matmul %1, %42, %cst_18 {dimension_numbers = #tpu.dot_dimension_numbers<[1], [0], [0], [1], [0, 0, 1, 1], [], []>} : vector<32x128xbf16>, vector<128x128xbf16>, vector<32x128xf32> -> vector<32x128xf32>
    %44 = vector.broadcast %6 : vector<32x1xf32> to vector<32x128xf32>
    %45 = arith.addf %43, %44 : vector<32x128xf32>
    %46 = arith.mulf %45, %45 : vector<32x128xf32>
    %47 = tpu.concatenate %45, %46 in 0 : vector<32x128xf32>, vector<32x128xf32> -> vector<64x128xf32>
    %cst_19 = arith.constant dense<0.000000e+00> : vector<64xf32>
    %48 = vector.multi_reduction <add>, %47, %cst_19 [1] : vector<64x128xf32> to vector<64xf32>
    %49 = vector.shape_cast %48 : vector<64xf32> to vector<64x1xf32>
    %50 = vector.extract_strided_slice %49 {offsets = [0, 0], sizes = [32, 1], strides = [1, 1]} : vector<64x1xf32> to vector<32x1xf32>
    %51 = vector.shape_cast %50 : vector<32x1xf32> to vector<1x32x1xf32>
    %cst_20 = arith.constant dense<0.000000e+00> : vector<1xf32>
    %52 = vector.multi_reduction <add>, %51, %cst_20 [1, 2] : vector<1x32x1xf32> to vector<1xf32>
    %53 = vector.shape_cast %52 : vector<1xf32> to vector<1x1x1xf32>
    %54 = vector.extract %53[0, 0, 0] : f32 from vector<1x1x1xf32>
    %cst_21 = arith.constant 2.44140625E-4 : f32
    %55 = arith.mulf %54, %cst_21 : f32
    %56 = vector.extract_strided_slice %49 {offsets = [32, 0], sizes = [32, 1], strides = [1, 1]} : vector<64x1xf32> to vector<32x1xf32>
    %57 = vector.shape_cast %56 : vector<32x1xf32> to vector<1x32x1xf32>
    %cst_22 = arith.constant dense<0.000000e+00> : vector<1xf32>
    %58 = vector.multi_reduction <add>, %57, %cst_22 [1, 2] : vector<1x32x1xf32> to vector<1xf32>
    %59 = vector.shape_cast %58 : vector<1xf32> to vector<1x1x1xf32>
    %60 = vector.extract %59[0, 0, 0] : f32 from vector<1x1x1xf32>
    %cst_23 = arith.constant 2.44140625E-4 : f32
    %61 = arith.mulf %60, %cst_23 : f32
    %62 = arith.mulf %55, %55 : f32
    %63 = arith.subf %61, %62 : f32
    %cst_24 = arith.constant 9.99999974E-6 : f32
    %64 = arith.addf %63, %cst_24 : f32
    %65 = math.rsqrt %64 : f32
    %66 = vector.broadcast %65 : f32 to vector<32x1xf32>
    %67 = arith.mulf %7, %66 : vector<32x1xf32>
    %68 = vector.broadcast %55 : f32 to vector<32x1xf32>
    %69 = arith.mulf %68, %67 : vector<32x1xf32>
    %70 = arith.subf %8, %69 : vector<32x1xf32>
    %71 = vector.broadcast %67 : vector<32x1xf32> to vector<32x128xf32>
    %72 = arith.mulf %45, %71 : vector<32x128xf32>
    %73 = vector.broadcast %70 : vector<32x1xf32> to vector<32x128xf32>
    %74 = arith.addf %72, %73 : vector<32x128xf32>
    %c0_25 = arith.constant 0 : index
    %c0_26 = arith.constant 0 : index
    %c0_27 = arith.constant 0 : index
    %75 = vector.load %arg6[%c0_25, %c0_26, %c0_27] : memref<1x32x128xf32, #tpu.memory_space<vmem>>, vector<1x32x128xf32>
    %76 = vector.shape_cast %75 : vector<1x32x128xf32> to vector<32x128xf32>
    %77 = vector.shape_cast %74 : vector<32x128xf32> to vector<1x32x128xf32>
    tpu.vector_store %arg6[%c0_25, %c0_26, %c0_27], %77 {strides = array<i32>} : memref<1x32x128xf32, #tpu.memory_space<vmem>>, vector<1x32x128xf32>,
    return
  }
  func.func @transform_0(%arg0: i32) -> (i32, i32, i32) {
    %c0_i32 = arith.constant 0 : i32
    %c0_i32_0 = arith.constant 0 : i32
    %c0_i32_1 = arith.constant 0 : i32
    return %arg0, %c0_i32, %c0_i32_0 : i32, i32, i32
  }
  func.func @transform_1(%arg0: i32) -> (i32, i32) {
    %c0_i32 = arith.constant 0 : i32
    %c0_i32_0 = arith.constant 0 : i32
    %c0_i32_1 = arith.constant 0 : i32
    return %c0_i32, %c0_i32_0 : i32, i32
  }
  func.func @transform_2(%arg0: i32) -> (i32, i32) {
    %c0_i32 = arith.constant 0 : i32
    %c0_i32_0 = arith.constant 0 : i32
    %c0_i32_1 = arith.constant 0 : i32
    return %c0_i32, %c0_i32_0 : i32, i32
  }
  func.func @transform_3(%arg0: i32) -> (i32, i32) {
    %c0_i32 = arith.constant 0 : i32
    %c0_i32_0 = arith.constant 0 : i32
    %c0_i32_1 = arith.constant 0 : i32
    return %c0_i32, %c0_i32_0 : i32, i32
  }
  func.func @transform_4(%arg0: i32) -> (i32, i32) {
    %c0_i32 = arith.constant 0 : i32
    %c0_i32_0 = arith.constant 0 : i32
    %c0_i32_1 = arith.constant 0 : i32
    return %c0_i32, %c0_i32_0 : i32, i32
  }
  func.func @transform_5(%arg0: i32) -> (i32, i32, i32) {
    %c0_i32 = arith.constant 0 : i32
    %c0_i32_0 = arith.constant 0 : i32
    %c0_i32_1 = arith.constant 0 : i32
    return %arg0, %c0_i32, %c0_i32_0 : i32, i32, i32
  }
}

</mosaic_0001>

<bundles_post_ra>
// kernel: tpu_custom_call.1
= control target key start
LH: loop header
LB: loop body
LE: loop exit
PB: predicated region body
PF: predicated region fallthrough
CT: control target
= control target key end

     0   :  { %10 = vsyncpa [#allocation3], 0  ;;  %s2569_s0 = inlined_call_operand.vmem [shape: bf16[2,32,128], index: 0, kind: input, shape index: {}]   ;;  %s2570_s1 = inlined_call_operand.vmem [shape: bf16[384,32], index: 1, kind: input, shape index: {}]   ;;  %s2571_s2 = inlined_call_operand.vmem [shape: bf16[32,128], index: 2, kind: input, shape index: {}]   ;;  %s2572_s3 = inlined_call_operand.vmem [shape: bf16[128,128], index: 3, kind: input, shape index: {}]   ;;  %s2573_s4 = inlined_call_operand.vmem [shape: f32[32,3], index: 4, kind: input, shape index: {}]   ;;  %s2574_s5 = inlined_call_operand.hbm [shape: f32[2,32,128], index: 5, kind: output, shape index: {}]  }
   0x1   :  { %12 = vsyncpa [#allocation3 + $0x1], 0  ;;  %s1987_s18 = smov 0   ;;  %s1989_s19 = smov 0  }
   0x2   :  { %s1991_s20 = smov 0   ;;  %s1993_s21 = smov 0  }
   0x3 LB: > { %s2008_s22 = sadd.s32 4294967295, %s1949_s21   ;;  %s1451_s23 = sadd.s32 4294967294, %s1949_s21   ;;  %s1949_s21 = sphi %s1993_s21, %s2580_s21   ;;  %s1945_s20 = sphi %s1991_s20, %s2579_s20   ;;  %s1941_s19 = sphi %s1989_s19, %s2578_s19   ;;  %s1937_s18 = sphi %s1987_s18, %s2577_s18  }
   0x4   : > { %s2012_s24 = sadd.s32 1, %s1949_s21   ;;  %s135_s25 = sadd.s32 1, %s1945_s20 }
   0x5   : > { %s132_s26 = ssub.s32 %s1949_s21, %s2012_s24  ;;  %p145_p0 = scmp.ne.s32.totalorder %s1945_s20, %s1941_s19 }
   0x6   : > { %p133_p1 = scmp.eq.s32.totalorder %s132_s26, 0  ;;  %p146_p2 = scmp.eq.s32.totalorder %s2008_s22, 1 }
   0x7   : > { %p151_p3 = scmp.ne.s32.totalorder %s1941_s19, %s1937_s18  ;;  %p152_p4 = scmp.eq.s32.totalorder %s1451_s23, 1 }
   0x8   : > { %s2023_s27 = scalar_select %p133_p1, %s1945_s20, %s135_s25  }
   0x9   : > { %p2025_p5 = por %p146_p2, %p145_p0  ;;  %p2029_p6 = por %p152_p4, %p151_p3 }
   0xa   : > { %p1454_p7 = scmp.ge.s32.totalorder %s1949_s21, 1  ;;  %p190_p8 = scmp.lt.s32.totalorder %s1949_s21, 3 }
   0xc   : > { %p191_p9 = pnand %p1454_p7, %p190_p8 }
   0xd   : > { %p218_p10 = scmp.lt.s32.totalorder (!%p191_p9), %s2008_s22, 1  ;;  %s1953_s14 = smov (!%p191_p9), 1  }
   0xe   : > { %194 = sbr.rel (%p191_p9) target bundleno = 1885 (0x75d), region = 40  ;;  %s215_s15 = sand.u32 (!%p191_p9), 1, %s1941_s19  }
   0xf   : > { %s1455_s16 = sshll.u32 (!%p191_p9), %s215_s15, 5  ;;  %s1692_s23 = sshll.u32 (!%p191_p9), %s2008_s22, 5 }
  0x10   : > { %s217_s17 = scalar_lea.vmem (!%p191_p9), [#allocation2], %s1455_s16 }
  0x13   : > { %s219_s30 = scalar_select %p218_p10, %s2008_s22, 1  ;;  %v1656_v2 = vld [vmem:[%s2570_s1] sm:$0xff]  ;;  %v1670_v3 = vld [vmem:[%s2570_s1 + $0x70] sm:$0xff]  ;;  %vm464_vm0 = vcmask 261120   ;;  %v1657_v4 = vld [vmem:[%s2570_s1 + $0x8] sm:$0xff] }
  0x14   : > { %v1671_v5 = vld [vmem:[%s2570_s1 + $0x78] sm:$0xff]  ;;  %v1658_v6 = vld [vmem:[%s2570_s1 + $0x10] sm:$0xff]  ;;  %v1660_v8 = vld [vmem:[%s2570_s1 + $0x20] sm:$0xff] }
  0x15   : > { %s1655_s6 = sshll.u32 %s219_s30, 4  ;;  %v1659_v7 = vld [vmem:[%s2570_s1 + $0x18] sm:$0xff]  ;;  %v1661_v9 = vld [vmem:[%s2570_s1 + $0x28] sm:$0xff]  ;;  %v1662_v10 = vld [vmem:[%s2570_s1 + $0x30] sm:$0xff]  ;;  %s1385_s30 = scalar_lea.hbm %s2574_s5, %s1692_s23 }
  0x16   : > { %s222_s9 = scalar_lea.vmem %s2569_s0, %s1655_s6  ;;  %v1663_v11 = vld [vmem:[%s2570_s1 + $0x38] sm:$0xff]  ;;  %v1664_v12 = vld [vmem:[%s2570_s1 + $0x40] sm:$0xff]  ;;  %v1665_v17 = vld [vmem:[%s2570_s1 + $0x48] sm:$0xff] }
  0x17   : > { %v1691_v0 = vld [vmem:[%s222_s9 + $0x8] sm:$0xff]  ;;  %v1690_v1 = vld [vmem:[%s222_s9] sm:$0xff]  ;;  %v1666_v22 = vld [vmem:[%s2570_s1 + $0x50] sm:$0xff] }
  0x18   : > { %543 = vmatpush.bf16.msra.mxu0 %v1691_v0  ;;  %1693 = vmatpush.bf16.msra.mxu1 %v1691_v0  ;;  %v1667_v25 = vld [vmem:[%s2570_s1 + $0x58] sm:$0xff]  ;;  %v1668_v28 = vld [vmem:[%s2570_s1 + $0x60] sm:$0xff]  ;;  %v1669_v31 = vld [vmem:[%s2570_s1 + $0x68] sm:$0xff] }
  0x19   : > { %1694 = vmatpush.bf16.msra.mxu3 %v1691_v0  ;;  %v1672_v37 = vld [vmem:[%s2570_s1 + $0x80] sm:$0xff]  ;;  %v1673_v59 = vld [vmem:[%s2570_s1 + $0x88] sm:$0xff] }
  0x1c   : > { %544 = vmatpush.bf16.msra.mxu0 %v1690_v1  ;;  %1695 = vmatpush.bf16.msra.mxu1 %v1690_v1 }
  0x1d   : > { %1696 = vmatpush.bf16.msra.mxu3 %v1690_v1 }
  0x1f   : > { %1562 = vmatmul.msk.bf16.vlgmr.msra.gmra.mxu0 %vm464_vm0, %v1656_v2  ;;  %1576 = vmatmul.msk.bf16.vlgmr.msra.gmra.mxu1 %vm464_vm0, %v1670_v3 }
  0x2f   : > { %1563 = vmatmul.msk.bf16.gmra.mxu0 %vm464_vm0, %v1657_v4  ;;  %1577 = vmatmul.msk.bf16.gmra.mxu1 %vm464_vm0, %v1671_v5 }
  0x3f   : > { %1564 = vmatmul.msk.bf16.gmra.mxu0 %vm464_vm0, %v1658_v6  ;;  %1578 = vmatmul.msk.bf16.gmra.mxu1 %vm464_vm0, %v1672_v37 }
  0x4f   : > { %1565 = vmatmul.msk.bf16.gmra.mxu0 %vm464_vm0, %v1659_v7  ;;  %1579 = vmatmul.msk.bf16.gmra.mxu1 %vm464_vm0, %v1673_v59 }
  0x5f   : > { %1566 = vmatmul.msk.bf16.gmra.mxu0 %vm464_vm0, %v1660_v8 }
  0x6f   : > { %1567 = vmatmul.msk.bf16.gmra.mxu0 %vm464_vm0, %v1661_v9 }
  0x7f   : > { %1568 = vmatmul.msk.bf16.gmra.mxu0 %vm464_vm0, %v1662_v10 }
  0x8f   : > { %1569 = vmatmul.msk.bf16.gmra.mxu0 %vm464_vm0, %v1663_v11 }
  0x9c   : > { %v2083_v13 = vpop.f32.mrf.mxu0  ;;  %v2085_v14 = vpop.f32.mrf.mxu1 }
  0x9d   : > { %896 = vmax.xlane.f32.xlu1 %v2085_v14 }
  0x9f   : > { %1570 = vmatmul.msk.bf16.gmra.mxu0 %vm464_vm0, %v1664_v12 }
  0xa4   : > { %v2089_v15 = vpop.f32.mrf.mxu0  ;;  %v2091_v16 = vpop.f32.mrf.mxu1 }
  0xa5   : > { %898 = vmax.xlane.f32.xlu1 %v2091_v16 }
  0xac   : > { %v2097_v18 = vpop.f32.mrf.mxu0  ;;  %v2099_v19 = vpop.f32.mrf.mxu1 }
  0xad   : > { %900 = vmax.xlane.f32.xlu0 %v2099_v19 }
  0xaf   : > { %1571 = vmatmul.msk.bf16.gmra.mxu0 %vm464_vm0, %v1665_v17 }
  0xb4   : > { %v2103_v20 = vpop.f32.mrf.mxu0  ;;  %v2105_v21 = vpop.f32.mrf.mxu1 }
  0xb5   : > { %902 = vmax.xlane.f32.xlu0 %v2105_v21 }
  0xbc   : > { %v2111_v23 = vpop.f32.mrf.mxu0 }
  0xbd   : > { %v666_v39 = vmax.f32 %v2083_v13, %v2111_v23 }
  0xbf   : > { %1572 = vmatmul.msk.bf16.gmra.mxu0 %vm464_vm0, %v1666_v22 }
  0xc4   : > { %v2114_v24 = vpop.f32.mrf.mxu0 }
  0xc5   : > { %v667_v38 = vmax.f32 %v2089_v15, %v2114_v24 }
  0xcc   : > { %v2119_v26 = vpop.f32.mrf.mxu0 }
  0xcd   : > { %v668_v40 = vmax.f32 %v2097_v18, %v2119_v26 }
  0xcf   : > { %1573 = vmatmul.msk.bf16.gmra.mxu0 %vm464_vm0, %v1667_v25 }
  0xd4   : > { %v2122_v27 = vpop.f32.mrf.mxu0 }
  0xd5   : > { %v669_v41 = vmax.f32 %v2103_v20, %v2122_v27 }
  0xdc   : > { %v566_v29 = vpop.f32.mrf.mxu0 }
  0xdd   : > { %v670_v43 = vmax.f32 %v666_v39, %v566_v29 }
  0xdf   : > { %1574 = vmatmul.msk.bf16.gmra.mxu0 %vm464_vm0, %v1668_v28 }
  0xe4   : > { %v568_v30 = vpop.f32.mrf.mxu0 }
  0xe5   : > { %v671_v42 = vmax.f32 %v667_v38, %v568_v30 }
  0xec   : > { %v571_v32 = vpop.f32.mrf.mxu0 }
  0xed   : > { %v672_v44 = vmax.f32 %v668_v40, %v571_v32 }
  0xef   : > { %1575 = vmatmul.msk.bf16.gmra.mxu0 %vm464_vm0, %v1669_v31 }
  0xf4   : > { %v573_v33 = vpop.f32.mrf.mxu0 }
  0xf5   : > { %v673_v45 = vmax.f32 %v669_v41, %v573_v33 }
  0xfc   : > { %v576_v34 = vpop.f32.mrf.mxu0 }
  0xfd   : > { %v674_v48 = vmax.f32 %v670_v43, %v576_v34 }
 0x104   : > { %v578_v35 = vpop.f32.mrf.mxu0 }
 0x105   : > { %v675_v46 = vmax.f32 %v671_v42, %v578_v35 }
 0x107   : > { %v678_v51 = vmax.f32 %v674_v48, %v675_v46 }
 0x10c   : > { %v581_v36 = vpop.f32.mrf.mxu0 }
 0x10d   : > { %v676_v49 = vmax.f32 %v672_v44, %v581_v36 }
 0x114   : > { %v583_v47 = vpop.f32.mrf.mxu0 }
 0x115   : > { %v677_v50 = vmax.f32 %v673_v45, %v583_v47 }
 0x117   : > { %v679_v52 = vmax.f32 %v676_v49, %v677_v50 }
 0x119   : > { %v680_v53 = vmax.f32 %v678_v51, %v679_v52 }
 0x11b   : > { %v681_v54 = vrot.slane %v680_v53, 4 }
 0x11c   : > { %v2144_v55 = vpop.f32.mrf.mxu0 }
 0x11d   : > { %v682_v56 = vmax.f32 %v680_v53, %v681_v54 }
 0x11f   : > { %v683_v57 = vrot.slane %v682_v56, 2 }
 0x121   : > { %v684_v58 = vmax.f32 %v682_v56, %v683_v57 }
 0x123   : > { %v685_v60 = vrot.slane %v684_v58, 1 }
 0x124   : > { %v2150_v61 = vpop.f32.mrf.mxu0 }
 0x125   : > { %v2152_v62 = vmax.f32 %v684_v58, %v685_v60 }
 0x127   : > { %v702_v63 = vsub.f32 %v583_v47, %v2152_v62  ;;  %v701_v0 = vsub.f32 %v581_v36, %v2152_v62  ;;  %v699_v1 = vsub.f32 %v576_v34, %v2152_v62  ;;  %v700_v2 = vsub.f32 %v578_v35, %v2152_v62 }
 0x128   : > { %v697_v5 = vsub.f32 %v571_v32, %v2152_v62  ;;  %v698_v7 = vsub.f32 %v573_v33, %v2152_v62  ;;  %v695_v11 = vsub.f32 %v566_v29, %v2152_v62  ;;  %v696_v17 = vsub.f32 %v568_v30, %v2152_v62 }
 0x129   : > { %v733_v3 = vmul.f32 1.442695, %v702_v63  ;;  %v731_v4 = vmul.f32 1.442695, %v701_v0  ;;  %v727_v6 = vmul.f32 1.442695, %v699_v1  ;;  %v693_v28 = vsub.f32 %v2119_v26, %v2152_v62 }
 0x12a   : > { %v729_v8 = vmul.f32 1.442695, %v700_v2  ;;  %v723_v10 = vmul.f32 1.442695, %v697_v5  ;;  %v725_v12 = vmul.f32 1.442695, %v698_v7  ;;  %v694_v33 = vsub.f32 %v2122_v27, %v2152_v62 }
 0x12b   : > { %1757 = vpow2.f32 %v733_v3  ;;  %v719_v25 = vmul.f32 1.442695, %v695_v11  ;;  %v721_v32 = vmul.f32 1.442695, %v696_v17  ;;  %v715_v36 = vmul.f32 1.442695, %v693_v28  ;;  %v897_v11 = vpop.xlane.xlu1 %896 }
 0x12c   : > { %v2160_v9 = vpop.f32.mrf.mxu0  ;;  %1759 = vpow2.f32 %v731_v4  ;;  %v691_v26 = vsub.f32 %v2111_v23, %v2152_v62  ;;  %v717_v37 = vmul.f32 1.442695, %v694_v33  ;;  %v692_v27 = vsub.f32 %v2114_v24, %v2152_v62  ;;  %v1682_v2 = vld [vmem:[%s2572_s3] sm:$0xff]  ;;  %v901_v4 = vpop.xlane.xlu0 %900  ;;  %v1684_v28 = vld [vmem:[%s2572_s3 + $0x10] sm:$0xff] }
 0x12d   : > { %1761 = vpow2.f32 %v727_v6  ;;  %v689_v42 = vsub.f32 %v2097_v18, %v2152_v62  ;;  %v690_v43 = vsub.f32 %v2103_v20, %v2152_v62  ;;  %v687_v18 = vsub.f32 %v2083_v13, %v2152_v62  ;;  %v1683_v6 = vld [vmem:[%s2572_s3 + $0x8] sm:$0xff] }
 0x12e   : > { %1763 = vpow2.f32 %v729_v8  ;;  %v711_v41 = vmul.f32 1.442695, %v691_v26  ;;  %v713_v23 = vmul.f32 1.442695, %v692_v27  ;;  %v688_v20 = vsub.f32 %v2089_v15, %v2152_v62  ;;  %v1685_v27 = vld [vmem:[%s2572_s3 + $0x18] sm:$0xff] }
 0x12f   : > { %1765 = vpow2.f32 %v723_v10  ;;  %v707_v47 = vmul.f32 1.442695, %v689_v42  ;;  %v709_v48 = vmul.f32 1.442695, %v690_v43  ;;  %v703_v52 = vmul.f32 1.442695, %v687_v18 }
 0x130   : > { %1767 = vpow2.f32 %v725_v12  ;;  %v705_v53 = vmul.f32 1.442695, %v688_v20  ;;  %v1688_v20 = vld [vmem:[%s2572_s3 + $0x30] sm:$0xff] }
 0x131   : > { %v2164_v22 = vpop.eup %1757  ;;  %1769 = vpow2.f32 %v719_v25  ;;  %v916_v25 = vsub.f32 %v2085_v14, %v897_v11 }
 0x132   : > { %v2168_v31 = vpop.eup %1759  ;;  %1771 = vpow2.f32 %v721_v32 }
 0x133   : > { %v742_v29 = vpack.c.bf16 %v2164_v22, %v2168_v31  ;;  %v2174_v34 = vpop.eup %1761  ;;  %1773 = vpow2.f32 %v715_v36  ;;  %v944_v32 = vmul.f32 1.442695, %v916_v25  ;;  %v899_v33 = vpop.xlane.xlu1 %898 }
 0x134   : > { %v2176_v30 = vpop.f32.mrf.mxu0  ;;  %v2178_v35 = vpop.eup %1763  ;;  %1775 = vpow2.f32 %v717_v37  ;;  %v917_v14 = vsub.f32 %v2091_v16, %v899_v33  ;;  %v918_v37 = vsub.f32 %v2099_v19, %v901_v4  ;;  %v1686_v19 = vld [vmem:[%s2572_s3 + $0x20] sm:$0xff] }
 0x135   : > { %791 = vmatpush.bf16.msrb.mxu1 %v742_v29  ;;  %v2184_v38 = vpop.eup %1765  ;;  %v741_v39 = vpack.c.bf16 %v2178_v35, %v2174_v34  ;;  %1777 = vpow2.f32 %v711_v41  ;;  %v903_v7 = vpop.xlane.xlu0 %902 }
 0x136   : > { %v2188_v40 = vpop.eup %1767  ;;  %1779 = vpow2.f32 %v713_v23  ;;  %v919_v10 = vsub.f32 %v2105_v21, %v903_v7  ;;  %v946_v36 = vmul.f32 1.442695, %v917_v14  ;;  %v2279_v41 = vpop.f32.mrf.mxu1 }
 0x137   : > { %v2194_v44 = vpop.eup %1769  ;;  %v740_v24 = vpack.c.bf16 %v2188_v40, %v2184_v38  ;;  %1781 = vpow2.f32 %v707_v47 }
 0x138   : > { %v2198_v45 = vpop.eup %1771  ;;  %1783 = vpow2.f32 %v709_v48  ;;  %v950_v12 = vmul.f32 1.442695, %v919_v10 }
 0x139   : > { %792 = vmatpush.bf16.msrb.mxu1 %v741_v39  ;;  %v2206_v49 = vpop.eup %1773  ;;  %v739_v50 = vpack.c.bf16 %v2198_v45, %v2194_v44  ;;  %1785 = vpow2.f32 %v703_v52  ;;  %v948_v39 = vmul.f32 1.442695, %v918_v37 }
 0x13a   : > { %v2210_v51 = vpop.eup %1775  ;;  %1787 = vpow2.f32 %v705_v53 }
 0x13b   : > { %v2212_v54 = vpop.eup %1777  ;;  %v738_v13 = vpack.c.bf16 %v2210_v51, %v2206_v49  ;;  %1789 = vpow2.f32 %v950_v12 }
 0x13c   : > { %v2200_v46 = vpop.f32.mrf.mxu0  ;;  %v2216_v56 = vpop.eup %1779  ;;  %1791 = vpow2.f32 %v944_v32 }
 0x13d   : > { %793 = vmatpush.bf16.msrb.mxu1 %v740_v24  ;;  %v2220_v57 = vpop.eup %1781  ;;  %v737_v58 = vpack.c.bf16 %v2216_v56, %v2212_v54  ;;  %1793 = vpow2.f32 %v946_v36  ;;  %v1687_v24 = vld [vmem:[%s2572_s3 + $0x28] sm:$0xff] }
 0x13e   : > { %v2224_v59 = vpop.eup %1783  ;;  %1795 = vpow2.f32 %v948_v39  ;;  %v2287_v23 = vpop.f32.mrf.mxu1 }
 0x13f   : > { %v2226_v60 = vpop.eup %1785  ;;  %v736_v62 = vpack.c.bf16 %v2224_v59, %v2220_v57  ;;  %v1016_v43 = vpack.c.bf16 %v2287_v23, %v2279_v41 }
 0x140   : > { %v2230_v63 = vpop.eup %1787 }
 0x141   : > { %794 = vmatpush.bf16.msrb.mxu1 %v739_v50  ;;  %v735_v1 = vpack.c.bf16 %v2230_v63, %v2226_v60  ;;  %v2258_v21 = vpop.eup %1789  ;;  %v1689_v50 = vld [vmem:[%s2572_s3 + $0x38] sm:$0xff] }
 0x142   : > { %v2266_v26 = vpop.eup %1791 }
 0x143   : > { %v2275_v16 = vpop.eup %1793 }
 0x144   : > { %v2218_v15 = vpop.f32.mrf.mxu0  ;;  %v2281_v42 = vpop.eup %1795 }
 0x145   : > { %795 = vmatpush.bf16.msrb.mxu1 %v738_v13 }
 0x146   : > { %v2295_v47 = vpop.f32.mrf.mxu1 }
 0x149   : > { %796 = vmatpush.bf16.msrb.mxu1 %v737_v58 }
 0x14c   : > { %v2232_v0 = vpop.f32.mrf.mxu0 }
 0x14d   : > { %797 = vmatpush.bf16.msrb.mxu1 %v736_v62 }
 0x14e   : > { %v2297_v18 = vpop.f32.mrf.mxu1 }
 0x14f   : > { %v1017_v48 = vpack.c.bf16 %v2297_v18, %v2295_v47 }
 0x151   : > { %798 = vmatpush.bf16.msrb.mxu1 %v735_v1 }
 0x154   : > { %799 = vmatmul.bf16.vlgmr.msrb.gmra.mxu1 %v1682_v2  ;;  %v2239_v3 = vpop.f32.mrf.mxu0 }
 0x15c   : > { %v606_v5 = vpop.f32.mrf.mxu0 }
 0x15d   : > { %888 = vmax.xlane.f32.xlu0 %v606_v5 }
 0x164   : > { %804 = vmatmul.bf16.gmra.mxu1 %v1683_v6  ;;  %v2244_v8 = vpop.f32.mrf.mxu0 }
 0x165   : > { %886 = vmax.xlane.f32.xlu0 %v2239_v3  ;;  %890 = vmax.xlane.f32.xlu1 %v2244_v8 }
 0x16c   : > { %v2249_v17 = vpop.f32.mrf.mxu0 }
 0x16d   : > { %876 = vmax.xlane.f32.xlu0 %v2160_v9  ;;  %880 = vmax.xlane.f32.xlu1 %v2200_v46 }
 0x16e   : > { %892 = vmax.xlane.f32.xlu2 %v2249_v17 }
 0x174   : > { %809 = vmatmul.bf16.gmra.mxu1 %v1684_v28  ;;  %v2260_v29 = vpop.f32.mrf.mxu0 }
 0x175   : > { %982 = vadd.xlane.f32.xlu0 %v2258_v21  ;;  %878 = vmax.xlane.f32.xlu1 %v2176_v30 }
 0x176   : > { %894 = vmax.xlane.f32.xlu2 %v2260_v29 }
 0x17d   : > { %976 = vadd.xlane.f32.xlu0 %v2266_v26  ;;  %872 = vmax.xlane.f32.xlu1 %v2144_v55 }
 0x17e   : > { %884 = vmax.xlane.f32.xlu2 %v2232_v0 }
 0x184   : > { %814 = vmatmul.bf16.gmra.mxu1 %v1685_v27 }
 0x185   : > { %978 = vadd.xlane.f32.xlu1 %v2275_v16 }
 0x186   : > { %882 = vmax.xlane.f32.xlu2 %v2218_v15 }
 0x18e   : > { %980 = vadd.xlane.f32.xlu2 %v2281_v42 }
 0x194   : > { %819 = vmatmul.bf16.gmra.mxu1 %v1686_v19 }
 0x196   : > { %874 = vmax.xlane.f32.xlu2 %v2150_v61 }
 0x1a4   : > { %824 = vmatmul.bf16.gmra.mxu1 %v1687_v24 }
 0x1b4   : > { %829 = vmatmul.bf16.gmra.mxu1 %v1688_v20 }
 0x1c4   : > { %834 = vmatmul.bf16.gmra.mxu1 %v1689_v50 }
 0x1d0   : > { %v889_v52 = vpop.xlane.xlu0 %888 }
 0x1d1   : > { %v800_v53 = vpop.f32.mrf.mxu1  ;;  %v912_v13 = vsub.f32 %v606_v5, %v889_v52 }
 0x1d3   : > { %v936_v58 = vmul.f32 1.442695, %v912_v13 }
 0x1d5   : > { %1797 = vpow2.f32 %v936_v58 }
 0x1d6   : > { %1799 = vrcp.f32 %v800_v53 }
 0x1d8   : > { %v887_v62 = vpop.xlane.xlu0 %886  ;;  %v891_v7 = vpop.xlane.xlu1 %890 }
 0x1d9   : > { %v802_v1 = vpop.f32.mrf.mxu1  ;;  %v911_v2 = vsub.f32 %v2239_v3, %v887_v62  ;;  %v913_v39 = vsub.f32 %v2244_v8, %v891_v7 }
 0x1da   : > { %1801 = vrcp.f32 %v802_v1 }
 0x1db   : > { %v2308_v4 = vpop.eup %1797  ;;  %v934_v6 = vmul.f32 1.442695, %v911_v2  ;;  %v938_v24 = vmul.f32 1.442695, %v913_v39 }
 0x1dc   : > { %968 = vadd.xlane.f32.xlu1 %v2308_v4  ;;  %v1800_v10 = vpop.eup %1799 }
 0x1dd   : > { %1803 = vpow2.f32 %v934_v6  ;;  %v2313_v32 = vmul.f32 %v1800_v10, %v2226_v60 }
 0x1e0   : > { %v1802_v11 = vpop.eup %1801  ;;  %v877_v12 = vpop.xlane.xlu0 %876 }
 0x1e1   : > { %v805_v25 = vpop.f32.mrf.mxu1  ;;  %v906_v5 = vsub.f32 %v2160_v9, %v877_v12  ;;  %v893_v28 = vpop.xlane.xlu2 %892  ;;  %v2316_v3 = vmul.f32 %v1802_v11, %v2230_v63 }
 0x1e2   : > { %v914_v33 = vsub.f32 %v2249_v17, %v893_v28  ;;  %v881_v9 = vpop.xlane.xlu1 %880 }
 0x1e3   : > { %v2319_v14 = vpop.eup %1803  ;;  %v924_v36 = vmul.f32 1.442695, %v906_v5  ;;  %v1105_v37 = vpack.c.bf16 %v2316_v3, %v2313_v32  ;;  %v908_v8 = vsub.f32 %v2200_v46, %v881_v9 }
 0x1e4   : > { %v940_v27 = vmul.f32 1.442695, %v914_v33  ;;  %966 = vadd.xlane.f32.xlu1 %v2319_v14 }
 0x1e5   : > { %1805 = vpow2.f32 %v924_v36  ;;  %v928_v6 = vmul.f32 1.442695, %v908_v8 }
 0x1e6   : > { %1807 = vpow2.f32 %v940_v27 }
 0x1e7   : > { %1809 = vrcp.f32 %v805_v25 }
 0x1e8   : > { %v983_v33 = vpop.xlane.xlu0 %982 }
 0x1e9   : > { %v807_v60 = vpop.f32.mrf.mxu1  ;;  %v895_v63 = vpop.xlane.xlu2 %894 }
 0x1ea   : > { %1811 = vrcp.f32 %v807_v60  ;;  %v915_v17 = vsub.f32 %v2260_v29, %v895_v63  ;;  %v879_v13 = vpop.xlane.xlu1 %878 }
 0x1eb   : > { %v2326_v19 = vpop.eup %1805 }
 0x1ec   : > { %v942_v20 = vmul.f32 1.442695, %v915_v17  ;;  %956 = vadd.xlane.f32.xlu1 %v2326_v19  ;;  %v2329_v50 = vpop.eup %1807 }
 0x1ed   : > { %v1810_v52 = vpop.eup %1809  ;;  %972 = vadd.xlane.f32.xlu2 %v2329_v50 }
 0x1ee   : > { %1813 = vpow2.f32 %v942_v20  ;;  %v2334_v29 = vmul.f32 %v1810_v52, %v2220_v57  ;;  %v907_v57 = vsub.f32 %v2176_v30, %v879_v13 }
 0x1ef   : > { %1815 = vpow2.f32 %v938_v24 }
 0x1f0   : > { %v1812_v53 = vpop.eup %1811  ;;  %v926_v5 = vmul.f32 1.442695, %v907_v57 }
 0x1f1   : > { %v810_v58 = vpop.f32.mrf.mxu1  ;;  %v885_v62 = vpop.xlane.xlu2 %884  ;;  %v2337_v1 = vmul.f32 %v1812_v53, %v2224_v59 }
 0x1f2   : > { %v910_v2 = vsub.f32 %v2232_v0, %v885_v62  ;;  %v873_v12 = vpop.xlane.xlu1 %872  ;;  %v977_v53 = vpop.xlane.xlu0 %976 }
 0x1f3   : > { %v1106_v7 = vpack.c.bf16 %v2337_v1, %v2334_v29  ;;  %v904_v39 = vsub.f32 %v2144_v55, %v873_v12 }
 0x1f4   : > { %v2342_v10 = vpop.eup %1813  ;;  %v932_v11 = vmul.f32 1.442695, %v910_v2 }
 0x1f5   : > { %v2344_v46 = vpop.eup %1815  ;;  %974 = vadd.xlane.f32.xlu0 %v2342_v10  ;;  %v920_v24 = vmul.f32 1.442695, %v904_v39 }
 0x1f6   : > { %1817 = vpow2.f32 %v932_v11  ;;  %970 = vadd.xlane.f32.xlu2 %v2344_v46  ;;  %v1674_v11 = vld [vmem:[%s2570_s1 + $0x90] sm:$0xff] }
 0x1f7   : > { %1819 = vpow2.f32 %v928_v6  ;;  %1580 = vmatmul.msk.bf16.vlgmr.msra.gmra.mxu3 %vm464_vm0, %v1674_v11 }
 0x1f8   : > { %1821 = vrcp.f32 %v810_v58 }
 0x1f9   : > { %v812_v59 = vpop.f32.mrf.mxu1  ;;  %v883_v0 = vpop.xlane.xlu2 %882 }
 0x1fa   : > { %1823 = vrcp.f32 %v812_v59  ;;  %v909_v25 = vsub.f32 %v2218_v15, %v883_v0  ;;  %v979_v52 = vpop.xlane.xlu1 %978 }
 0x1fc   : > { %v2350_v28 = vpop.eup %1817  ;;  %v930_v36 = vmul.f32 1.442695, %v909_v25 }
 0x1fd   : > { %v2352_v27 = vpop.eup %1819  ;;  %964 = vadd.xlane.f32.xlu0 %v2350_v28 }
 0x1fe   : > { %v1822_v9 = vpop.eup %1821  ;;  %1825 = vpow2.f32 %v930_v36  ;;  %960 = vadd.xlane.f32.xlu2 %v2352_v27 }
 0x1ff   : > { %1827 = vpow2.f32 %v926_v5  ;;  %v2358_v63 = vmul.f32 %v1822_v9, %v2212_v54 }
 0x200   : > { %v1824_v30 = vpop.eup %1823  ;;  %1829 = vrcp.f32 %v983_v33 }
 0x201   : > { %v815_v60 = vpop.f32.mrf.mxu1  ;;  %v981_v15 = vpop.xlane.xlu2 %980  ;;  %v2361_v17 = vmul.f32 %v1824_v30, %v2216_v56 }
 0x202   : > { %1831 = vrcp.f32 %v981_v15 }
 0x203   : > { %v1107_v20 = vpack.c.bf16 %v2361_v17, %v2358_v63  ;;  %1833 = vpow2.f32 %v920_v24  ;;  %v1675_v24 = vld [vmem:[%s2570_s1 + $0x98] sm:$0xff] }
 0x204   : > { %v2365_v55 = vpop.eup %1825  ;;  %1835 = vrcp.f32 %v979_v52 }
 0x205   : > { %v2367_v8 = vpop.eup %1827  ;;  %962 = vadd.xlane.f32.xlu0 %v2365_v55  ;;  %1837 = vrcp.f32 %v815_v60 }
 0x206   : > { %958 = vadd.xlane.f32.xlu2 %v2367_v8  ;;  %v1830_v54 = vpop.eup %1829  ;;  %1839 = vrcp.f32 %v977_v53  ;;  %v1677_v53 = vld [vmem:[%s2570_s1 + $0xa8] sm:$0xff] }
 0x207   : > { %v1015_v6 = vmul.f32 %v1830_v54, %v2258_v21  ;;  %1581 = vmatmul.msk.bf16.gmra.mxu3 %vm464_vm0, %v1675_v24 }
 0x208   : > { %v1832_v56 = vpop.eup %1831 }
 0x209   : > { %v817_v13 = vpop.f32.mrf.mxu1  ;;  %v875_v58 = vpop.xlane.xlu2 %874  ;;  %v1014_v2 = vmul.f32 %v1832_v56, %v2281_v42 }
 0x20a   : > { %1841 = vrcp.f32 %v817_v13  ;;  %v905_v62 = vsub.f32 %v2150_v61, %v875_v58  ;;  %v2377_v57 = vpop.eup %1833  ;;  %v1678_v13 = vld [vmem:[%s2570_s1 + $0xb0] sm:$0xff] }
 0x20b   : > { %v1031_v0 = vpack.c.bf16 %v1015_v6, %v1014_v2  ;;  %v1836_v12 = vpop.eup %1835 }
 0x20c   : > { %v922_v59 = vmul.f32 1.442695, %v905_v62  ;;  %v1838_v25 = vpop.eup %1837  ;;  %v1013_v21 = vmul.f32 %v1836_v12, %v2275_v16 }
 0x20d   : > { %952 = vadd.xlane.f32.xlu0 %v2377_v57  ;;  %1032 = vmatpush.bf16.xpose.msra.mxu2 %v1031_v0  ;;  %v1840_v61 = vpop.eup %1839  ;;  %v862_v33 = vmul.f32 %v1838_v25, %v2206_v49 }
 0x20e   : > { %1843 = vpow2.f32 %v922_v59  ;;  %v1012_v9 = vmul.f32 %v1840_v61, %v2266_v26 }
 0x210   : > { %v1842_v42 = vpop.eup %1841  ;;  %v1030_v60 = vpack.c.bf16 %v1013_v21, %v1012_v9 }
 0x211   : > { %v820_v5 = vpop.f32.mrf.mxu1  ;;  %v863_v36 = vmul.f32 %v1842_v42, %v2210_v51  ;;  %v1676_v51 = vld [vmem:[%s2570_s1 + $0xa0] sm:$0xff] }
 0x213   : > { %v1108_v39 = vpack.c.bf16 %v863_v36, %v862_v33 }
 0x214   : > { %v2385_v30 = vpop.eup %1843 }
 0x215   : > { %954 = vadd.xlane.f32.xlu1 %v2385_v30  ;;  %1033 = vmatpush.bf16.xpose.msra.mxu2 %v1030_v60 }
 0x217   : > { %1582 = vmatmul.msk.bf16.gmra.mxu3 %vm464_vm0, %v1676_v51 }
 0x219   : > { %v822_v15 = vpop.f32.mrf.mxu1 }
 0x221   : > { %v825_v16 = vpop.f32.mrf.mxu1 }
 0x227   : > { %1583 = vmatmul.msk.bf16.gmra.mxu3 %vm464_vm0, %v1677_v53 }
 0x229   : > { %v827_v49 = vpop.f32.mrf.mxu1 }
 0x231   : > { %v830_v26 = vpop.f32.mrf.mxu1 }
 0x237   : > { %1584 = vmatmul.msk.bf16.gmra.mxu3 %vm464_vm0, %v1678_v13 }
 0x239   : > { %v832_v52 = vpop.f32.mrf.mxu1 }
 0x241   : > { %v835_v54 = vpop.f32.mrf.mxu1 }
 0x242   : > { %1845 = vrcp.f32 %v835_v54 }
 0x243   : > { %1847 = vrcp.f32 %v832_v52 }
 0x248   : > { %v1846_v58 = vpop.eup %1845 }
 0x249   : > { %v837_v56 = vpop.f32.mrf.mxu1  ;;  %v1848_v62 = vpop.eup %1847  ;;  %v870_v6 = vmul.f32 %v1846_v58, %v2168_v31 }
 0x24a   : > { %1849 = vrcp.f32 %v837_v56  ;;  %v869_v12 = vmul.f32 %v1848_v62, %v2178_v35  ;;  %v1679_v35 = vld [vmem:[%s2570_s1 + $0xb8] sm:$0xff] }
 0x24b   : > { %1851 = vrcp.f32 %v830_v26  ;;  %1585 = vmatmul.msk.bf16.gmra.mxu3 %vm464_vm0, %v1679_v35 }
 0x24c   : > { %1853 = vrcp.f32 %v827_v49 }
 0x24d   : > { %1855 = vrcp.f32 %v825_v16 }
 0x24e   : > { %1857 = vrcp.f32 %v822_v15 }
 0x24f   : > { %1859 = vrcp.f32 %v820_v5 }
 0x250   : > { %v1850_v2 = vpop.eup %1849 }
 0x251   : > { %v871_v11 = vmul.f32 %v1850_v2, %v2164_v22  ;;  %v1852_v59 = vpop.eup %1851 }
 0x252   : > { %v1854_v25 = vpop.eup %1853  ;;  %v868_v61 = vmul.f32 %v1852_v59, %v2174_v34 }
 0x253   : > { %v1112_v0 = vpack.c.bf16 %v871_v11, %v870_v6  ;;  %v1856_v42 = vpop.eup %1855  ;;  %v867_v33 = vmul.f32 %v1854_v25, %v2188_v40 }
 0x254   : > { %v1111_v21 = vpack.c.bf16 %v869_v12, %v868_v61  ;;  %v1858_v36 = vpop.eup %1857  ;;  %v866_v31 = vmul.f32 %v1856_v42, %v2184_v38  ;;  %v969_v38 = vpop.xlane.xlu1 %968 }
 0x255   : > { %1113 = vmatpush.bf16.msrb.mxu3 %v1112_v0  ;;  %v1860_v9 = vpop.eup %1859  ;;  %v865_v60 = vmul.f32 %v1858_v36, %v2198_v45 }
 0x256   : > { %v1110_v22 = vpack.c.bf16 %v867_v33, %v866_v31  ;;  %v864_v5 = vmul.f32 %v1860_v9, %v2194_v44 }
 0x258   : > { %v1109_v34 = vpack.c.bf16 %v865_v60, %v864_v5  ;;  %v276_v60 = vld [vmem:[%s2572_s3] sm:$0xff]  }
 0x259   : > { %1114 = vmatpush.bf16.msrb.mxu3 %v1111_v21  ;;  %v292_v5 = vunpack.c.l.bf16 %v276_v60 }
 0x25b   : > { %vm308_vm1 = vcmp.ne.f32.partialorder %v292_v5, 0.0 }
 0x25d   : > { %1115 = vmatpush.bf16.msrb.mxu3 %v1110_v22 }
 0x260   : > { %v973_v15 = vpop.xlane.xlu2 %972 }
 0x261   : > { %1116 = vmatpush.bf16.msrb.mxu3 %v1109_v34  ;;  %1861 = vrcp.f32 %v973_v15  ;;  %v293_v34 = vunpack.c.h.bf16 %v276_v60 }
 0x263   : > { %vm309_vm2 = vcmp.ne.f32.partialorder %v293_v34, 0.0 }
 0x264   : > { %vm1618_vm3 = vmpackc.low %vm309_vm2, %vm308_vm1 }
 0x265   : > { %1117 = vmatpush.bf16.msrb.mxu3 %v1108_v39 }
 0x267   : > { %v1862_v24 = vpop.eup %1861 }
 0x268   : > { %v975_v40 = vpop.xlane.xlu0 %974  ;;  %v1010_v39 = vmul.f32 %v1862_v24, %v2329_v50 }
 0x269   : > { %1863 = vrcp.f32 %v975_v40  ;;  %1118 = vmatpush.bf16.msrb.mxu3 %v1107_v20  ;;  %v971_v45 = vpop.xlane.xlu2 %970  ;;  %v967_v20 = vpop.xlane.xlu1 %966 }
 0x26a   : > { %1865 = vrcp.f32 %v971_v45 }
 0x26b   : > { %1867 = vrcp.f32 %v969_v38  ;;  %v278_v38 = vld [vmem:[%s2572_s3 + $0x8] sm:$0xff]  }
 0x26c   : > { %v294_v24 = vunpack.c.l.bf16 %v278_v38 }
 0x26d   : > { %1119 = vmatpush.bf16.msrb.mxu3 %v1106_v7 }
 0x26e   : > { %vm310_vm4 = vcmp.ne.f32.partialorder %v294_v24, 0.0  ;;  %v2470_v24 = vld [vmem:[%s2573_s4 + $0x8] sm:$0xff] }
 0x26f   : > { %v1864_v44 = vpop.eup %1863 }
 0x270   : > { %v965_v16 = vpop.xlane.xlu0 %964  ;;  %v1011_v49 = vmul.f32 %v1864_v44, %v2342_v10  ;;  %v1866_v17 = vpop.eup %1865  ;;  %v295_v44 = vunpack.c.h.bf16 %v278_v38 }
 0x271   : > { %1120 = vmatpush.bf16.msrb.mxu3 %v1105_v37  ;;  %v1868_v51 = vpop.eup %1867  ;;  %1869 = vrcp.f32 %v965_v16  ;;  %v1009_v29 = vmul.f32 %v1866_v17, %v2344_v46  ;;  %v961_v1 = vpop.xlane.xlu2 %960 }
 0x272   : > { %v1029_v63 = vpack.c.bf16 %v1011_v49, %v1010_v39  ;;  %1871 = vrcp.f32 %v967_v20  ;;  %v1008_v7 = vmul.f32 %v1868_v51, %v2308_v4  ;;  %v957_v37 = vpop.xlane.xlu1 %956  ;;  %vm311_vm5 = vcmp.ne.f32.partialorder %v295_v44, 0.0  ;;  %v280_v49 = vld [vmem:[%s2572_s3 + $0x10] sm:$0xff]  }
 0x273   : > { %vm1621_vm6 = vmpackc.low %vm311_vm5, %vm310_vm4  ;;  %v296_v17 = vunpack.c.l.bf16 %v280_v49  ;;  %v297_v20 = vunpack.c.h.bf16 %v280_v49  ;;  %v2475_v44 = vld [vmem:[%s2573_s4 + $0x10] sm:$0xff]  ;;  %v2488_v49 = vld [vmem:[%s2573_s4 + $0x18] sm:$0xff] }
 0x274   : > { %1034 = vmatpush.bf16.xpose.msra.mxu2 %v1029_v63  ;;  %v1028_v50 = vpack.c.bf16 %v1009_v29, %v1008_v7 }
 0x275   : > { %vm312_vm7 = vcmp.ne.f32.partialorder %v296_v17, 0.0  ;;  %vm313_vm8 = vcmp.ne.f32.partialorder %v297_v20, 0.0  ;;  %v1681_v17 = vld [vmem:[%s2571_s2 + $0x8] sm:$0xff] }
 0x276   : > { %vm1624_vm9 = vmpackc.low %vm313_vm8, %vm312_vm7 }
 0x277   : > { %v1870_v52 = vpop.eup %1869 }
 0x278   : > { %v963_v26 = vpop.xlane.xlu0 %962  ;;  %v1872_v10 = vpop.eup %1871  ;;  %v1006_v32 = vmul.f32 %v1870_v52, %v2350_v28 }
 0x279   : > { %1873 = vrcp.f32 %v963_v26  ;;  %v1007_v3 = vmul.f32 %v1872_v10, %v2319_v14  ;;  %v959_v53 = vpop.xlane.xlu2 %958 }
 0x27a   : > { %1875 = vrcp.f32 %v961_v1  ;;  %v636_v61 = vpop.f32.mrf.mxu3  ;;  %v282_v1 = vld [vmem:[%s2572_s3 + $0x18] sm:$0xff]  }
 0x27b   : > { %v1027_v54 = vpack.c.bf16 %v1007_v3, %v1006_v32  ;;  %1877 = vrcp.f32 %v959_v53  ;;  %v298_v26 = vunpack.c.l.bf16 %v282_v1  ;;  %v284_v32 = vld [vmem:[%s2572_s3 + $0x20] sm:$0xff]  }
 0x27c   : > { %1035 = vmatpush.bf16.xpose.msra.mxu2 %v1028_v50  ;;  %1879 = vrcp.f32 %v957_v37  ;;  %v299_v50 = vunpack.c.h.bf16 %v282_v1  ;;  %v300_v37 = vunpack.c.l.bf16 %v284_v32  ;;  %v301_v53 = vunpack.c.h.bf16 %v284_v32 }
 0x27d   : > { %vm314_vm10 = vcmp.ne.f32.partialorder %v298_v26, 0.0 }
 0x27e   : > { %vm315_vm11 = vcmp.ne.f32.partialorder %v299_v50, 0.0  ;;  %vm316_vm13 = vcmp.ne.f32.partialorder %v300_v37, 0.0  ;;  %vm317_vm14 = vcmp.ne.f32.partialorder %v301_v53, 0.0 }
 0x27f   : > { %v1874_v56 = vpop.eup %1873  ;;  %vm1627_vm12 = vmpackc.low %vm315_vm11, %vm314_vm10 }
 0x280   : > { %v1876_v46 = vpop.eup %1875  ;;  %v1005_v4 = vmul.f32 %v1874_v56, %v2365_v55  ;;  %v953_v6 = vpop.xlane.xlu0 %952  ;;  %vm1630_vm15 = vmpackc.low %vm317_vm14, %vm316_vm13 }
 0x281   : > { %v1004_v13 = vmul.f32 %v1876_v46, %v2352_v27  ;;  %v1878_v2 = vpop.eup %1877  ;;  %v286_v46 = vld [vmem:[%s2572_s3 + $0x28] sm:$0xff]  }
 0x282   : > { %v1880_v28 = vpop.eup %1879  ;;  %v1003_v14 = vmul.f32 %v1878_v2, %v2367_v8  ;;  %v638_v42 = vpop.f32.mrf.mxu3 }
 0x283   : > { %v1026_v62 = vpack.c.bf16 %v1005_v4, %v1004_v13  ;;  %v1002_v11 = vmul.f32 %v1880_v28, %v2326_v19  ;;  %v1018_v21 = vpack.c.bf16 %v638_v42, %v636_v61  ;;  %v302_v13 = vunpack.c.l.bf16 %v286_v46 }
 0x284   : > { %1036 = vmatpush.bf16.xpose.msra.mxu2 %v1027_v54 }
 0x285   : > { %v1025_v59 = vpack.c.bf16 %v1003_v14, %v1002_v11  ;;  %vm318_vm0 = vcmp.ne.f32.partialorder %v302_v13, 0.0 }
 0x288   : > { %v955_v58 = vpop.xlane.xlu1 %954 }
 0x289   : > { %1881 = vrcp.f32 %v955_v58  ;;  %v303_v58 = vunpack.c.h.bf16 %v286_v46 }
 0x28a   : > { %1883 = vrcp.f32 %v953_v6  ;;  %v641_v19 = vpop.f32.mrf.mxu3  ;;  %v288_v6 = vld [vmem:[%s2572_s3 + $0x30] sm:$0xff]  }
 0x28b   : > { %vm319_vm1 = vcmp.ne.f32.partialorder %v303_v58, 0.0  ;;  %v304_v14 = vunpack.c.l.bf16 %v288_v6  ;;  %v305_v11 = vunpack.c.h.bf16 %v288_v6 }
 0x28c   : > { %1037 = vmatpush.bf16.xpose.msra.mxu2 %v1026_v62  ;;  %vm1633_vm2 = vmpackc.low %vm319_vm1, %vm318_vm0 }
 0x28d   : > { %vm321_vm4 = vcmp.ne.f32.partialorder %v305_v11, 0.0 }
 0x28f   : > { %v1882_v0 = vpop.eup %1881 }
 0x290   : > { %v1884_v12 = vpop.eup %1883  ;;  %v1001_v55 = vmul.f32 %v1882_v0, %v2385_v30 }
 0x291   : > { %v1000_v27 = vmul.f32 %v1884_v12, %v2377_v57  ;;  %v290_v12 = vld [vmem:[%s2572_s3 + $0x38] sm:$0xff]  }
 0x292   : > { %v643_v8 = vpop.f32.mrf.mxu3 }
 0x293   : > { %v1024_v25 = vpack.c.bf16 %v1001_v55, %v1000_v27  ;;  %v1019_v30 = vpack.c.bf16 %v643_v8, %v641_v19  ;;  %v306_v27 = vunpack.c.l.bf16 %v290_v12 }
 0x294   : > { %1038 = vmatpush.bf16.xpose.msra.mxu2 %v1025_v59 }
 0x29a   : > { %v646_v33 = vpop.f32.mrf.mxu3 }
 0x29c   : > { %1039 = vmatpush.bf16.xpose.msra.mxu2 %v1024_v25  ;;  %v307_v25 = vunpack.c.h.bf16 %v290_v12 }
 0x29e   : > { %vm323_vm7 = vcmp.ne.f32.partialorder %v307_v25, 0.0 }
 0x2a2   : > { %v648_v36 = vpop.f32.mrf.mxu3 }
 0x2a3   : > { %1040 = vmatmul.bf16.vlgmr.msra.gmra.mxu2 %v1016_v43  ;;  %v1020_v31 = vpack.c.bf16 %v648_v36, %v646_v33 }
 0x2aa   : > { %v651_v57 = vpop.f32.mrf.mxu3 }
 0x2b2   : > { %v653_v9 = vpop.f32.mrf.mxu3 }
 0x2b3   : > { %1045 = vmatmul.bf16.gmra.mxu2 %v1017_v48  ;;  %v1021_v41 = vpack.c.bf16 %v653_v9, %v651_v57 }
 0x2ba   : > { %v656_v22 = vpop.f32.mrf.mxu3 }
 0x2c2   : > { %v658_v23 = vpop.f32.mrf.mxu3 }
 0x2c3   : > { %1050 = vmatmul.bf16.gmra.mxu2 %v1018_v21  ;;  %v1022_v43 = vpack.c.bf16 %v658_v23, %v656_v22 }
 0x2ce   : > { %v661_v47 = vpop.f32.mrf.mxu3 }
 0x2d3   : > { %1055 = vmatmul.bf16.gmra.mxu2 %v1019_v30 }
 0x2d6   : > { %v663_v18 = vpop.f32.mrf.mxu3 }
 0x2d7   : > { %v1023_v48 = vpack.c.bf16 %v663_v18, %v661_v47 }
 0x2e3   : > { %1060 = vmatmul.bf16.gmra.mxu2 %v1020_v31 }
 0x2f3   : > { %1065 = vmatmul.bf16.gmra.mxu2 %v1021_v41 }
 0x303   : > { %1070 = vmatmul.bf16.gmra.mxu2 %v1022_v43 }
 0x313   : > { %1075 = vmatmul.bf16.gmra.mxu2 %v1023_v48 }
 0x326   : > { %v1041_v35 = vpop.f32.mrf.mxu2 }
 0x32e   : > { %v1043_v15 = vpop.f32.mrf.mxu2 }
 0x32f   : > { %v1619_v40 = vpack.c.bf16 %v1043_v15, %v1041_v35 }
 0x331   : > { %1620 = vmatmul.msk.bf16.vlgmr.msrb.gmra.mxu3 %vm1618_vm3, %v1619_v40  ;;  %vm320_vm3 = vcmp.ne.f32.partialorder %v304_v14, 0.0 }
 0x332   : > { %vm1636_vm5 = vmpackc.low %vm321_vm4, %vm320_vm3 }
 0x336   : > { %v1046_v45 = vpop.f32.mrf.mxu2 }
 0x33e   : > { %v1048_v16 = vpop.f32.mrf.mxu2 }
 0x33f   : > { %v1622_v39 = vpack.c.bf16 %v1048_v16, %v1046_v45  ;;  %v1951_v16 = vmov 0  }
 0x340   : > { %1749 = vset.pattern.permute.xlu0 %v1951_v16  ;;  %1750 = vset.pattern.permute.xlu1 %v1951_v16 }
 0x341   : > { %1623 = vmatmul.msk.bf16.gmra.mxu3 %vm1621_vm6, %v1622_v39  ;;  %vm322_vm6 = vcmp.ne.f32.partialorder %v306_v27, 0.0  ;;  %v2480_v39 = vld [vmem:[%s2573_s4] sm:$0xff]  ;;  %1177 = vperm.xlu0 %1749, %v2470_v24  }
 0x342   : > { %vm1639_vm8 = vmpackc.low %vm323_vm7, %vm322_vm6  ;;  %1182 = vperm.xlu1 %1750, %v2475_v44   ;;  %1748 = vset.pattern.permute.xlu2 %v1951_v16 }
 0x343   : > { %1172 = vperm.xlu2 %1748, %v2480_v39  }
 0x346   : > { %v1051_v63 = vpop.f32.mrf.mxu2 }
 0x34b   : > { %1187 = vperm.xlu2 %1748, %v2488_v49  }
 0x34e   : > { %v1053_v51 = vpop.f32.mrf.mxu2 }
 0x34f   : > { %v1625_v29 = vpack.c.bf16 %v1053_v51, %v1051_v63  ;;  %v1680_v63 = vld [vmem:[%s2571_s2] sm:$0xff] }
 0x351   : > { %1626 = vmatmul.msk.bf16.gmra.mxu3 %vm1624_vm9, %v1625_v29  ;;  %vm1241_vm9 = vcmask 7168  }
 0x356   : > { %v1056_v7 = vpop.f32.mrf.mxu2 }
 0x35e   : > { %v1058_v52 = vpop.f32.mrf.mxu2 }
 0x35f   : > { %v1628_v10 = vpack.c.bf16 %v1058_v52, %v1056_v7 }
 0x361   : > { %1629 = vmatmul.msk.bf16.gmra.mxu3 %vm1627_vm12, %v1628_v10 }
 0x366   : > { %v1061_v3 = vpop.f32.mrf.mxu2 }
 0x36e   : > { %v1063_v54 = vpop.f32.mrf.mxu2 }
 0x36f   : > { %v1631_v56 = vpack.c.bf16 %v1063_v54, %v1061_v3 }
 0x371   : > { %1632 = vmatmul.msk.bf16.gmra.mxu3 %vm1630_vm15, %v1631_v56 }
 0x376   : > { %v1066_v4 = vpop.f32.mrf.mxu2 }
 0x37e   : > { %v1068_v62 = vpop.f32.mrf.mxu2 }
 0x37f   : > { %v1634_v2 = vpack.c.bf16 %v1068_v62, %v1066_v4 }
 0x381   : > { %1635 = vmatmul.msk.bf16.gmra.mxu3 %vm1633_vm2, %v1634_v2 }
 0x386   : > { %v1071_v28 = vpop.f32.mrf.mxu2 }
 0x38e   : > { %v1073_v59 = vpop.f32.mrf.mxu2 }
 0x38f   : > { %v1637_v0 = vpack.c.bf16 %v1073_v59, %v1071_v28 }
 0x391   : > { %1638 = vmatmul.msk.bf16.gmra.mxu3 %vm1636_vm5, %v1637_v0 }
 0x396   : > { %v1076_v55 = vpop.f32.mrf.mxu2 }
 0x39d   : > { %v1173_v20 = vpop.permute.xlu2 %1172 }
 0x39e   : > { %v1078_v61 = vpop.f32.mrf.mxu2 }
 0x39f   : > { %v1640_v42 = vpack.c.bf16 %v1078_v61, %v1076_v55 }
 0x3a1   : > { %1641 = vmatmul.msk.bf16.gmra.mxu3 %vm1639_vm8, %v1640_v42 }
 0x3a5   : > { %v1188_v53 = vpop.permute.xlu2 %1187 }
 0x3b3   : > { %v1178_v1 = vpop.permute.xlu0 %1177 }
 0x3b4   : > { %v1122_v19 = vpop.f32.mrf.mxu3  ;;  %v1183_v52 = vpop.permute.xlu1 %1182 }
 0x3bc   : > { %v1124_v8 = vpop.f32.mrf.mxu3 }
 0x3bd   : > { %v1162_v21 = vpack.c.bf16 %v1124_v8, %v1122_v19 }
 0x3c4   : > { %v1127_v33 = vpop.f32.mrf.mxu3 }
 0x3cc   : > { %v1129_v30 = vpop.f32.mrf.mxu3 }
 0x3cd   : > { %v1163_v36 = vpack.c.bf16 %v1129_v30, %v1127_v33 }
 0x3d4   : > { %v1132_v57 = vpop.f32.mrf.mxu3 }
 0x3dc   : > { %v1134_v31 = vpop.f32.mrf.mxu3 }
 0x3dd   : > { %v1164_v9 = vpack.c.bf16 %v1134_v31, %v1132_v57 }
 0x3e4   : > { %v1137_v22 = vpop.f32.mrf.mxu3 }
 0x3ec   : > { %v1139_v41 = vpop.f32.mrf.mxu3 }
 0x3ed   : > { %v1165_v23 = vpack.c.bf16 %v1139_v41, %v1137_v22 }
 0x3f4   : > { %v1142_v43 = vpop.f32.mrf.mxu3 }
 0x3fc   : > { %v1144_v47 = vpop.f32.mrf.mxu3 }
 0x3fd   : > { %v1166_v45 = vpack.c.bf16 %v1144_v47, %v1142_v43 }
 0x404   : > { %v1147_v18 = vpop.f32.mrf.mxu3 }
 0x40c   : > { %v1149_v48 = vpop.f32.mrf.mxu3 }
 0x40d   : > { %v1167_v38 = vpack.c.bf16 %v1149_v48, %v1147_v18 }
 0x414   : > { %v1152_v60 = vpop.f32.mrf.mxu3 }
 0x41c   : > { %v1154_v35 = vpop.f32.mrf.mxu3 }
 0x41d   : > { %v1168_v40 = vpack.c.bf16 %v1154_v35, %v1152_v60 }
 0x424   : > { %v1157_v5 = vpop.f32.mrf.mxu3 }
 0x42c   : > { %v1159_v34 = vpop.f32.mrf.mxu3 }
 0x42d   : > { %v1169_v15 = vpack.c.bf16 %v1159_v34, %v1157_v5 }
 0x42f   : > { %1202 = vmatpush.bf16.msra.mxu1 %v1169_v15 }
 0x433   : > { %1203 = vmatpush.bf16.msra.mxu1 %v1168_v40 }
 0x437   : > { %1204 = vmatpush.bf16.msra.mxu1 %v1167_v38 }
 0x43b   : > { %1205 = vmatpush.bf16.msra.mxu1 %v1166_v45 }
 0x43f   : > { %1206 = vmatpush.bf16.msra.mxu1 %v1165_v23 }
 0x443   : > { %1207 = vmatpush.bf16.msra.mxu1 %v1164_v9 }
 0x447   : > { %1208 = vmatpush.bf16.msra.mxu1 %v1163_v36 }
 0x44b   : > { %1209 = vmatpush.bf16.msra.mxu1 %v1162_v21 }
 0x44e   : > { %1210 = vmatmul.bf16.vlgmr.msra.gmra.mxu1 %v1680_v63 }
 0x45e   : > { %1215 = vmatmul.bf16.gmra.mxu1 %v1681_v17 }
 0x4cb   : > { %v1211_v51 = vpop.f32.mrf.mxu1 }
 0x4cc   : > { %v2497_v29 = vadd.f32 %v1211_v51, %v1173_v20  ;;  %v1952_v20 = vmov 1  }
 0x4cd   : > { %1751 = vset.pattern.permute.xlu2 %v1952_v20  ;;  %1752 = vset.pattern.permute.xlu1 %v1952_v20 }
 0x4ce   : > { %1225 = vadd.xlane.f32.xlu2 %v2497_v29  ;;  %v1221_v50 = vmul.f32 %v2497_v29, %v2497_v29  ;;  %1753 = vset.pattern.permute.xlu0 %v1952_v20 }
 0x4d3   : > { %v1213_v7 = vpop.f32.mrf.mxu1 }
 0x4d4   : > { %v2500_v26 = vadd.f32 %v1213_v7, %v1178_v1 }
 0x4d6   : > { %1227 = vadd.xlane.f32.xlu1 %v2500_v26  ;;  %1233 = vadd.xlane.f32.xlu2 %v1221_v50  ;;  %v1222_v32 = vmul.f32 %v2500_v26, %v2500_v26 }
 0x4db   : > { %v1216_v10 = vpop.f32.mrf.mxu1 }
 0x4dc   : > { %v2507_v3 = vadd.f32 %v1216_v10, %v1183_v52 }
 0x4de   : > { %1235 = vadd.xlane.f32.xlu1 %v1222_v32  ;;  %1229 = vadd.xlane.f32.xlu0 %v2507_v3  ;;  %v1223_v56 = vmul.f32 %v2507_v3, %v2507_v3 }
 0x4e3   : > { %v1218_v37 = vpop.f32.mrf.mxu1 }
 0x4e4   : > { %v2510_v54 = vadd.f32 %v1218_v37, %v1188_v53 }
 0x4e6   : > { %1231 = vadd.xlane.f32.xlu2 %v2510_v54  ;;  %1237 = vadd.xlane.f32.xlu1 %v1223_v56  ;;  %v1224_v46 = vmul.f32 %v2510_v54, %v2510_v54 }
 0x4ee   : > { %1239 = vadd.xlane.f32.xlu2 %v1224_v46  ;;  %v1954_v46 = vmov 2  }
 0x541   : > { %v1226_v4 = vpop.xlane.xlu2 %1225 }
 0x542   : > { %v1242_v28 = vsel %vm1241_vm9, %v1226_v4, 0.0 }
 0x549   : > { %v1228_v13 = vpop.xlane.xlu1 %1227  ;;  %v1234_v58 = vpop.xlane.xlu2 %1233 }
 0x54a   : > { %v1243_v6 = vsel %vm1241_vm9, %v1228_v13, 0.0  ;;  %v1259_v61 = vsel %vm1241_vm9, %v1234_v58, 0.0 }
 0x54b   : > { %v1244_v11 = vadd.f32 %v1243_v6, %v1242_v28 }
 0x551   : > { %v1236_v62 = vpop.xlane.xlu1 %1235  ;;  %v1230_v2 = vpop.xlane.xlu0 %1229 }
 0x552   : > { %v1245_v14 = vsel %vm1241_vm9, %v1230_v2, 0.0  ;;  %v1260_v25 = vsel %vm1241_vm9, %v1236_v62, 0.0 }
 0x553   : > { %v1246_v0 = vadd.f32 %v1245_v14, %v1244_v11  ;;  %v1261_v19 = vadd.f32 %v1260_v25, %v1259_v61 }
 0x559   : > { %v1232_v59 = vpop.xlane.xlu2 %1231  ;;  %v1238_v55 = vpop.xlane.xlu1 %1237 }
 0x55a   : > { %v1247_v12 = vsel %vm1241_vm9, %v1232_v59, 0.0  ;;  %v1262_v42 = vsel %vm1241_vm9, %v1238_v55, 0.0 }
 0x55b   : > { %v1248_v27 = vadd.f32 %v1247_v12, %v1246_v0  ;;  %v1263_v8 = vadd.f32 %v1262_v42, %v1261_v19 }
 0x55d   : > { %1249 = vadd.xlane.f32.xlu0 %v1248_v27 }
 0x561   : > { %v1240_v21 = vpop.xlane.xlu2 %1239 }
 0x562   : > { %v1264_v33 = vsel %vm1241_vm9, %v1240_v21, 0.0 }
 0x563   : > { %v1265_v30 = vadd.f32 %v1264_v33, %v1263_v8 }
 0x565   : > { %1266 = vadd.xlane.f32.xlu1 %v1265_v30 }
 0x5d0   : > { %v1250_v36 = vpop.xlane.xlu0 %1249 }
 0x5d1   : > { %v1251_v57 = vrot.slane %v1250_v36, 4 }
 0x5d3   : > { %v1252_v31 = vadd.f32 %v1251_v57, %v1250_v36 }
 0x5d5   : > { %v1253_v9 = vrot.slane %v1252_v31, 2 }
 0x5d7   : > { %v1254_v22 = vadd.f32 %v1253_v9, %v1252_v31 }
 0x5d8   : > { %v1267_v41 = vpop.xlane.xlu1 %1266 }
 0x5d9   : > { %v1268_v23 = vrot.slane %v1267_v41, 4  ;;  %v1255_v43 = vrot.slane %v1254_v22, 1 }
 0x5db   : > { %v1269_v47 = vadd.f32 %v1268_v23, %v1267_v41  ;;  %v1256_v18 = vadd.f32 %v1255_v43, %v1254_v22 }
 0x5dd   : > { %v1270_v48 = vrot.slane %v1269_v47, 2  ;;  %1697 = vpush %v1256_v18 }
 0x5df   : > { %v1271_v60 = vadd.f32 %v1270_v48, %v1269_v47 }
 0x5e1   : > { %v1272_v35 = vrot.slane %v1271_v60, 1 }
 0x5e3   : > { %v1273_v5 = vadd.f32 %v1272_v35, %v1271_v60 }
 0x5e5   : > { %1699 = vpush %v1273_v5 }
 0x60e   : > { %s1698_s6 = spop %1697 }
 0x60f   : > { %s1258_s7 = smul.f32 0.00024414063, %s1698_s6  ;;  %s1386_s6 = sshll.u32 %s217_s17, 4  ;;  %s1387_s6 = int_to_ptr.vmem [resolvable:$true] %s1386_s6 }
 0x611   : > { %s1276_s8 = smul.f32 %s1258_s7, %s1258_s7  ;;  %v1296_v52 = vstv %s1258_s7  ;;  %s1388_s7 = sshll.u32 %s1385_s30, 4  ;;  %s1389_s7 = int_to_ptr.hbm [resolvable:$true] %s1388_s7 }
 0x616   : > { %s1700_s9 = spop %1699 }
 0x617   : > { %s1275_s10 = smul.f32 0.00024414063, %s1700_s9  ;;  %s1901_s9 = sshra.s32 %s1389_s7, 4  ;;  %s1902_s9 = int_to_ptr.hbm [resolvable:$true] %s1901_s9 }
 0x618   : > { %s1903_s22 = scalar_lea.hbm %s1902_s9, 32  ;;  %p1908_p0 = scmp.lt.s32.totalorder %s1902_s9, %s2574_s5 }
 0x619   : > { %s1277_s11 = ssub.f32 %s1275_s10, %s1276_s8  ;;  %s1374_s8 = scalar_lea.sflag [#allocation3], %s215_s15 }
 0x61a   : > { %p1904_p11 = scmp.ne.s32.totalorder %s1902_s9, %s1903_s22 }
 0x61b   : > { %s1278_s12 = sadd.f32 1e-05, %s1277_s11 }
 0x61c   : > { %p1905_p12 = pnand %p1904_p11, %p2025_p5 }
 0x61d   : > { %v1279_v34 = vstv %s1278_s12  ;;  %s1907_s12 = scalar_lea.hbm %s2574_s5, 64 }
 0x61e   : > { %1885 = vrsqrt.f32 %v1279_v34  ;;  %vm1286_vm11 = vweird.f32 %v1279_v34  ;;  %p1906_p13 = pneg %p1905_p12  ;;  %p1909_p1 = scmp.lt.s32.totalorder %s1907_s12, %s1903_s22 }
 0x620   : > { %p1910_p2 = por %p1909_p1, %p1908_p0 }
 0x622   : > { %p1911_p3 = pnand %p1910_p2, %p1906_p13 }
 0x624   : > { %v1886_v15 = vpop.eup %1885 }
 0x625   : > { %v1281_v40 = vmul.f32 %v1886_v15, %v1279_v34  ;;  %vm1287_vm10 = vweird.f32 %v1886_v15 }
 0x626   : > { %vm1288_vm12 = vmor %vm1286_vm11, %vm1287_vm10 }
 0x627   : > { %v1282_v38 = vmul.f32 %v1886_v15, %v1281_v40 }
 0x629   : > { %v1283_v45 = vmul.f32 0.5, %v1282_v38 }
 0x62b   : > { %v1284_v16 = vsub.f32 1.5, %v1283_v45 }
 0x62d   : > { %v1285_v63 = vmul.f32 %v1886_v15, %v1284_v16 }
 0x62f   : > { %v1289_v17 = vsel %vm1288_vm12, %v1886_v15, %v1285_v63 }
 0x630   : > { %1701 = vpush %v1289_v17 }
 0x661   : > { %s1702_s13 = spop %1701 }
 0x662   : > { %v1291_v51 = vstv %s1702_s13 }
 0x663   : > { %v1292_v1 = vmul.f32 %v1291_v51, %v2480_v39  ;;  %v1293_v7 = vmul.f32 %v1291_v51, %v2470_v24  ;;  %v1294_v50 = vmul.f32 %v1291_v51, %v2475_v44  ;;  %v1295_v53 = vmul.f32 %v1291_v51, %v2488_v49 }
 0x665   : > { %v1299_v10 = vmul.f32 %v1296_v52, %v1294_v50  ;;  %v1298_v32 = vmul.f32 %v1296_v52, %v1293_v7  ;;  %v1297_v37 = vmul.f32 %v1296_v52, %v1292_v1  ;;  %v1300_v56 = vmul.f32 %v1296_v52, %v1295_v53 }
 0x667   : > { %1309 = vrot.lane.b32.xlu1 %v1299_v10, %s1953_s14  ;;  %1307 = vrot.lane.b32.xlu0 %v1298_v32, %s1953_s14 }
 0x668   : > { %1305 = vrot.lane.b32.xlu2 %v1297_v37, %s1953_s14 }
 0x66f   : > { %1328 = vperm.xlu1 %1752, %v1293_v7   ;;  %1311 = vrot.lane.b32.xlu0 %v1300_v56, %s1953_s14 }
 0x670   : > { %1323 = vperm.xlu2 %1751, %v1292_v1  }
 0x677   : > { %1333 = vperm.xlu0 %1753, %v1294_v50   ;;  %1754 = vset.pattern.permute.xlu1 %v1954_v46 }
 0x678   : > { %1338 = vperm.xlu2 %1751, %v1295_v53  }
 0x67f   : > { %1756 = vset.pattern.permute.xlu0 %v1954_v46 }
 0x680   : > { %1755 = vset.pattern.permute.xlu2 %v1954_v46 }
 0x6c2   : > { %v1306_v4 = vpop.permute.xlu2 %1305 }
 0x6c3   : > { %v1317_v13 = vsub.f32 %v2480_v39, %v1306_v4 }
 0x6c5   : > { %1347 = vperm.xlu1 %1754, %v1317_v13  }
 0x6ca   : > { %v1324_v11 = vpop.permute.xlu2 %1323 }
 0x6cb   : > { %v1341_v12 = vmul.f32 %v1324_v11, %v2497_v29 }
 0x6d2   : > { %v1339_v59 = vpop.permute.xlu2 %1338 }
 0x6d3   : > { %v1344_v29 = vmul.f32 %v1339_v59, %v2510_v54 }
 0x6d9   : > { %v1310_v58 = vpop.permute.xlu1 %1309  ;;  %v1308_v62 = vpop.permute.xlu0 %1307 }
 0x6da   : > { %v1319_v2 = vsub.f32 %v2475_v44, %v1310_v58  ;;  %v1318_v6 = vsub.f32 %v2470_v24, %v1308_v62 }
 0x6dc   : > { %1352 = vperm.xlu2 %1755, %v1318_v6   ;;  %1357 = vperm.xlu1 %1754, %v1319_v2  }
 0x6e1   : > { %v1312_v28 = vpop.permute.xlu0 %1311  ;;  %v1329_v0 = vpop.permute.xlu1 %1328 }
 0x6e2   : > { %v1320_v14 = vsub.f32 %v2488_v49, %v1312_v28  ;;  %v1342_v39 = vmul.f32 %v1329_v0, %v2500_v26 }
 0x6e4   : > { %1362 = vperm.xlu0 %1756, %v1320_v14  }
 0x6e9   : > { %v1334_v25 = vpop.permute.xlu0 %1333 }
 0x6ea   : > { %v1343_v49 = vmul.f32 %v1334_v25, %v2507_v3 }
 0x736   : > { %v1353_v55 = vpop.permute.xlu2 %1352 }
 0x737   : > { %v1348_v44 = vpop.permute.xlu1 %1347  ;;  %v1366_v27 = vadd.f32 %v1353_v55, %v1342_v39 }
 0x738   : > { %v1365_v24 = vadd.f32 %v1348_v44, %v1341_v12 }
 0x739   : > { %1370 = vst [vmem:[%s217_s17 + $0x8] sm:$0xff] %v1366_v27 }
 0x73a   : > { %1369 = vst [vmem:[%s217_s17] sm:$0xff] %v1365_v24 }
 0x74e   : > { %v1358_v61 = vpop.permute.xlu1 %1357 }
 0x74f   : > { %v1367_v42 = vadd.f32 %v1358_v61, %v1343_v49 }
 0x751   : > { %1371 = vst [vmem:[%s217_s17 + $0x10] sm:$0xff] %v1367_v42 }
 0x756   : > { %v1363_v26 = vpop.permute.xlu0 %1362 }
 0x757   : > { %v1368_v19 = vadd.f32 %v1363_v26, %v1344_v29 }
 0x759   : > { %1372 = vst [vmem:[%s217_s17 + $0x18] sm:$0xff] %v1368_v19 }
 0x75a   : > { %1914 = shalt.err (!%p1911_p3)
}
 0x75b   : > { %s1955_s15 = smov 128   ;;  %s1956_s16 = smov 8  }
 0x75c   : > { %1703 = dma.vmem_to_hbm [thread:$0]  (%p2025_p5), %s1387_s6, 512, %s1389_s7, %s1374_s8, %s1955_s15, %s1955_s15, %s1956_s16  }
 0x75d PF: > { %p1709_p4 = scmp.ge.s32.totalorder %s1949_s21, 2  ;;  %s1403_s17 = sand.u32 1, %s1937_s18  }
 0x75e   : > { %s1404_s23 = scalar_lea.sflag [#allocation3], %s1403_s17 }
 0x75f   : > { %p1706_p7 = pnand %p1709_p4, %p2029_p6 }
 0x761   : > { %p1707_p8 = pneg %p1706_p7 }
 0x763   : > { %1932 = dma.done.wait (%p1707_p8), %s1404_s23, 512  }
 0x764   : > { %1934 = vsyncadd (%p1707_p8), %s1404_s23, 4294966784  ;;  %p15_p9 = scmp.ge.s32.totalorder %s2012_s24, 4   ;;  %s2577_s18 = smov %s1941_s19 }
 0x765   : > { %s2578_s19 = smov %s1945_s20  ;;  %s2579_s20 = smov %s2023_s27 }
 0x766   : > { %s2580_s21 = smov %s2012_s24  ;;  %17 = sbr.rel (!%p15_p9) target bundleno = 3 (0x3), region = 75 }
 0x76b   :  { %1410 = vsyncpa [#allocation3], 1 }
 0x76c   :  { %1412 = vsyncpa [#allocation3 + $0x1], 1 }

</bundles_post_ra>
